<compile_context>
chip_gen: v6e
topology: v6e:2x2x1
jax: 0.10.0
libtpu: 0.0.40
codegen_flags: <defaults>
</compile_context>

<pallas_src>
import jax
import jax.numpy as jnp
from jax.experimental import pallas as pl
from jax.experimental.pallas import tpu as pltpu


# ----------------------------------------------------------------------------
# Kernels
# ----------------------------------------------------------------------------
def se_kernel_nchw(x_ref, w1t_ref, b1_ref, w2t_ref, b2_ref, o_ref):
    """x_ref/o_ref: (Nb, C, HW)  (spatial on lanes).  w1t: (C, Cr) with 1/HW folded in,
    b1: (1, Cr) f32, w2t: (Cr, C), b2: (1, C) f32."""
    # Squeeze: f32-accumulating sum over the spatial (lane) axis; 1/HW is in w1t.
    pooled = jnp.sum(x_ref[...], axis=-1, dtype=jnp.float32)                 # (Nb, C)

    # Excitation: batched channel matmuls on the MXU, f32 accumulation.
    h = jnp.dot(pooled.astype(w1t_ref.dtype), w1t_ref[...],
                preferred_element_type=jnp.float32) + b1_ref[...]            # (Nb, Cr)
    h = jnp.maximum(h, 0.0)
    g = jnp.dot(h.astype(w2t_ref.dtype), w2t_ref[...],
                preferred_element_type=jnp.float32) + b2_ref[...]            # (Nb, C)
    g = jax.nn.sigmoid(g)                                                    # f32 gate

    # Scale: re-read x from VMEM (don't hold the tile live across the gate math),
    # multiply in f32, cast only at the store.
    o_ref[...] = (x_ref[...] * g[:, :, None]).astype(o_ref.dtype)


def se_kernel_nhwc(x_ref, w1t_ref, b1_ref, w2t_ref, b2_ref, o_ref):
    """x_ref/o_ref: (Nb, HW, C)  (channels on lanes -> unmasked full-width stores
    when C % 128 == 0; pool is a sublane reduce; gate broadcast is sublane-strided)."""
    pooled = jnp.sum(x_ref[...], axis=1, dtype=jnp.float32)                  # (Nb, C)

    h = jnp.dot(pooled.astype(w1t_ref.dtype), w1t_ref[...],
                preferred_element_type=jnp.float32) + b1_ref[...]            # (Nb, Cr)
    h = jnp.maximum(h, 0.0)
    g = jnp.dot(h.astype(w2t_ref.dtype), w2t_ref[...],
                preferred_element_type=jnp.float32) + b2_ref[...]            # (Nb, C)
    g = jax.nn.sigmoid(g)

    o_ref[...] = (x_ref[...] * g[:, None, :]).astype(o_ref.dtype)


# ----------------------------------------------------------------------------
# Tiling / VMEM helpers
# ----------------------------------------------------------------------------
def _vmem_capacity_bytes():
    try:
        return int(pltpu.get_tpu_info().vmem_capacity_bytes)
    except Exception:
        return 64 << 20   # conservative: v7x per-TensorCore VMEM


def _choose_nb(N, C, HW, itemsize, target_bytes):
    """Largest divisor of N whose (Nb, C, HW) tile fits target_bytes, preferring an
    even grid with >= 4 steps (>= 2 pipelined steps per TensorCore on v7x)."""
    divisors = [d for d in range(1, N + 1) if N % d == 0]
    fits = [d for d in divisors if d * C * HW * itemsize <= target_bytes]
    if not fits:
        # TODO(synk): take the two-pass HW-split path here instead of an oversized tile.
        return 1
    best = [d for d in fits if (N // d) >= 4 and (N // d) % 2 == 0]
    if not best:
        best = [d for d in fits if (N // d) >= 2]
    if not best:
        best = fits
    return max(best)


# ----------------------------------------------------------------------------
# Wrapper
# ----------------------------------------------------------------------------
def squeeze_excitation(x, w1, b1, w2, b2, *, data_format="NCHW", donate_x=False):
    """SE forward.

    x: (N, C, H, W) if data_format == "NCHW", else (N, H, W, C)   (f32 or bf16)
    w1: (C//r, C)   b1: (C//r,)   Conv2d(C, C//r, 1) weight (squeezed) / bias
    w2: (C, C//r)   b2: (C,)      Conv2d(C//r, C, 1) weight (squeezed) / bias
    """
    if data_format == "NCHW":
        N, C, H, W = x.shape
        HW = H * W
        x3 = x.reshape(N, C, HW)
        kernel = se_kernel_nchw
        x_block = lambda nb: (nb, C, HW)
    elif data_format == "NHWC":
        N, H, W, C = x.shape
        HW = H * W
        x3 = x.reshape(N, HW, C)
        kernel = se_kernel_nhwc
        x_block = lambda nb: (nb, HW, C)
    else:
        raise ValueError(f"unknown data_format {data_format!r}")

    Cr = w1.shape[0]
    itemsize = jnp.dtype(x.dtype).itemsize

    # Weight dtype follows activations (bf16 model -> bf16 weights, f32 accumulate).
    wdt = jnp.bfloat16 if x.dtype == jnp.bfloat16 else jnp.float32
    w1t = (jnp.asarray(w1, jnp.float32) / float(HW)).T.astype(wdt)   # (C, Cr), 1/HW folded
    w2t = jnp.asarray(w2, jnp.float32).T.astype(wdt)                 # (Cr, C)
    b1r = jnp.asarray(b1, jnp.float32).reshape(1, Cr)                # lane-dense f32 rows
    b2r = jnp.asarray(b2, jnp.float32).reshape(1, C)

    # Generation-aware tile target and VMEM limit.
    vmem_cap = _vmem_capacity_bytes()
    target_bytes = min(16 << 20, max(1 << 20, vmem_cap // 8))
    Nb = _choose_nb(N, C, HW, itemsize, target_bytes)
    grid_n = N // Nb

    tile_bytes = Nb * C * HW * itemsize
    weight_bytes = jnp.dtype(wdt).itemsize * 2 * C * Cr + 4 * (C + Cr)
    vmem_limit = int(min(int(vmem_cap * 0.85),
                         max(32 << 20, 4 * tile_bytes + 2 * weight_bytes + (1 << 20))))

    # Advisory cost: bandwidth-dominated (read x, write out), tiny matmuls + sigmoid.
    cost = pl.CostEstimate(
        flops=int(4 * N * C * Cr + 2 * N * C * HW),
        transcendentals=int(N * C),
        bytes_accessed=int(2 * N * C * HW * itemsize + 2 * weight_bytes),
    )

    blk = x_block(Nb)
    out = pl.pallas_call(
        kernel,
        out_shape=jax.ShapeDtypeStruct(x3.shape, x.dtype),
        grid_spec=pltpu.PrefetchScalarGridSpec(
            num_scalar_prefetch=0,
            grid=(grid_n,),
            in_specs=[
                pl.BlockSpec(blk, lambda n: (n, 0, 0)),        # x (batch-blocked)
                pl.BlockSpec((C, Cr), lambda n: (0, 0)),       # w1^T / HW
                pl.BlockSpec((1, Cr), lambda n: (0, 0)),       # b1 row
                pl.BlockSpec((Cr, C), lambda n: (0, 0)),       # w2^T
                pl.BlockSpec((1, C), lambda n: (0, 0)),        # b2 row
            ],
            out_specs=pl.BlockSpec(blk, lambda n: (n, 0, 0)),
        ),
        compiler_params=pltpu.CompilerParams(
            dimension_semantics=("parallel",),
            vmem_limit_bytes=vmem_limit,
        ),
        cost_estimate=cost,
        input_output_aliases={0: 0} if donate_x else {},
    )(x3, w1t, b1r, w2t, b2r)
    return out.reshape(x.shape)


# ----------------------------------------------------------------------------
# Pure-JAX reference (mirrors the PyTorch forward, NCHW)
# ----------------------------------------------------------------------------
def squeeze_excitation_ref(x, w1, b1, w2, b2):
    pooled = jnp.mean(x.astype(jnp.float32), axis=(2, 3), keepdims=True)    # (N, C, 1, 1)
    h = jnp.einsum("oc,nchw->nohw", w1, pooled) + b1.reshape(1, -1, 1, 1)
    h = jnp.maximum(h, 0.0)
    s = jnp.einsum("oc,nchw->nohw", w2, h) + b2.reshape(1, -1, 1, 1)
    s = jax.nn.sigmoid(s)
    return (x.astype(jnp.float32) * s).astype(x.dtype)


if __name__ == "__main__":
    # Module config: C channels, reduction r (conv weights (out,in,1,1) squeezed to (out,in)).
    N, C, H, W = 2, 4, 16, 16
    r = 2
    Cr = C // r

    key = jax.random.PRNGKey(0)
    kx, kw1, kb1, kw2, kb2 = jax.random.split(key, 5)

    x = jax.random.normal(kx, (N, C, H, W), dtype=jnp.float32)
    w1 = jax.random.uniform(kw1, (Cr, C), jnp.float32, -0.5, 0.5)   # Conv2d(C, C//r, 1).weight
    b1 = jax.random.uniform(kb1, (Cr,), jnp.float32, -0.5, 0.5)     # Conv2d(C, C//r, 1).bias
    w2 = jax.random.uniform(kw2, (C, Cr), jnp.float32, -0.5, 0.5)   # Conv2d(C//r, C, 1).weight
    b2 = jax.random.uniform(kb2, (C,), jnp.float32, -0.5, 0.5)      # Conv2d(C//r, C, 1).bias

    ref = squeeze_excitation_ref(x, w1, b1, w2, b2)

    # NCHW path (matches the PyTorch module layout).
    out = jax.block_until_ready(squeeze_excitation(x, w1, b1, w2, b2))
    assert out.shape == (N, C, H, W)
    assert jnp.allclose(out, ref, rtol=1e-5, atol=1e-5), "NCHW Pallas output mismatch vs reference"

    # Channels-last path (channels on lanes) — preferred for small-HW / large-C stages.
    x_nhwc = jnp.transpose(x, (0, 2, 3, 1))
    out_cl = jax.block_until_ready(
        squeeze_excitation(x_nhwc, w1, b1, w2, b2, data_format="NHWC"))
    out_cl_nchw = jnp.transpose(out_cl, (0, 3, 1, 2))
    assert jnp.allclose(out_cl_nchw, ref, rtol=1e-5, atol=1e-5), "NHWC Pallas output mismatch vs reference"

    print("KERNEL_OK")
</pallas_src>

<mosaic_0001>
module attributes {stable_mosaic.version = 11 : i64} {
  func.func @se_kernel_nchw(%arg0: i32, %arg1: memref<1x4x256xf32, #tpu.memory_space<vmem>>, %arg2: memref<4x2xf32, #tpu.memory_space<vmem>>, %arg3: memref<1x2xf32, #tpu.memory_space<vmem>>, %arg4: memref<2x4xf32, #tpu.memory_space<vmem>>, %arg5: memref<1x4xf32, #tpu.memory_space<vmem>>, %arg6: memref<1x4x256xf32, #tpu.memory_space<vmem>>) attributes {dimension_semantics = [#tpu.dimension_semantics<parallel>], iteration_bounds = array<i64: 2>, scalar_prefetch = 0 : i64, scratch_operands = 0 : i64, tpu.core_type = #tpu.core_type<tc>, window_params = [{transform_indices = @transform_0, window_bounds = array<i64: 1, 4, 256>}, {pipeline_mode = #tpu.pipeline_mode<synchronous>, transform_indices = @transform_1, window_bounds = array<i64: 4, 2>}, {pipeline_mode = #tpu.pipeline_mode<synchronous>, transform_indices = @transform_2, window_bounds = array<i64: 1, 2>}, {pipeline_mode = #tpu.pipeline_mode<synchronous>, transform_indices = @transform_3, window_bounds = array<i64: 2, 4>}, {pipeline_mode = #tpu.pipeline_mode<synchronous>, transform_indices = @transform_4, window_bounds = array<i64: 1, 4>}, {transform_indices = @transform_5, window_bounds = array<i64: 1, 4, 256>}]} {
    %c0 = arith.constant 0 : index
    %c0_0 = arith.constant 0 : index
    %c0_1 = arith.constant 0 : index
    %0 = vector.load %arg1[%c0, %c0_0, %c0_1] : memref<1x4x256xf32, #tpu.memory_space<vmem>>, vector<1x4x256xf32>
    %cst = arith.constant dense<0.000000e+00> : vector<1x4xf32>
    %1 = vector.multi_reduction <add>, %0, %cst [2] : vector<1x4x256xf32> to vector<1x4xf32>
    %c0_2 = arith.constant 0 : index
    %c0_3 = arith.constant 0 : index
    %2 = vector.load %arg2[%c0_2, %c0_3] : memref<4x2xf32, #tpu.memory_space<vmem>>, vector<4x2xf32>
    %cst_4 = arith.constant dense<0.000000e+00> : vector<1x2xf32>
    %3 = tpu.matmul %1, %2, %cst_4 {dimension_numbers = #tpu.dot_dimension_numbers<[1], [0], [0], [1], [0, 0, 1, 1], [], []>} : vector<1x4xf32>, vector<4x2xf32>, vector<1x2xf32> -> vector<1x2xf32>
    %c0_5 = arith.constant 0 : index
    %c0_6 = arith.constant 0 : index
    %4 = vector.load %arg3[%c0_5, %c0_6] : memref<1x2xf32, #tpu.memory_space<vmem>>, vector<1x2xf32>
    %5 = arith.addf %3, %4 : vector<1x2xf32>
    %cst_7 = arith.constant 0.000000e+00 : f32
    %6 = vector.broadcast %cst_7 : f32 to vector<1x2xf32>
    %7 = arith.maximumf %5, %6 : vector<1x2xf32>
    %c0_8 = arith.constant 0 : index
    %c0_9 = arith.constant 0 : index
    %8 = vector.load %arg4[%c0_8, %c0_9] : memref<2x4xf32, #tpu.memory_space<vmem>>, vector<2x4xf32>
    %cst_10 = arith.constant dense<0.000000e+00> : vector<1x4xf32>
    %9 = tpu.matmul %7, %8, %cst_10 {dimension_numbers = #tpu.dot_dimension_numbers<[1], [0], [0], [1], [0, 0, 1, 1], [], []>} : vector<1x2xf32>, vector<2x4xf32>, vector<1x4xf32> -> vector<1x4xf32>
    %c0_11 = arith.constant 0 : index
    %c0_12 = arith.constant 0 : index
    %10 = vector.load %arg5[%c0_11, %c0_12] : memref<1x4xf32, #tpu.memory_space<vmem>>, vector<1x4xf32>
    %11 = arith.addf %9, %10 : vector<1x4xf32>
    %12 = arith.negf %11 : vector<1x4xf32>
    %13 = math.exp %12 : vector<1x4xf32>
    %cst_13 = arith.constant 1.000000e+00 : f32
    %14 = vector.broadcast %cst_13 : f32 to vector<1x4xf32>
    %15 = arith.addf %14, %13 : vector<1x4xf32>
    %16 = arith.divf %14, %15 : vector<1x4xf32>
    %c0_14 = arith.constant 0 : index
    %c0_15 = arith.constant 0 : index
    %c0_16 = arith.constant 0 : index
    %17 = vector.load %arg1[%c0_14, %c0_15, %c0_16] : memref<1x4x256xf32, #tpu.memory_space<vmem>>, vector<1x4x256xf32>
    %18 = vector.shape_cast %16 : vector<1x4xf32> to vector<1x4x1xf32>
    %19 = vector.broadcast %18 : vector<1x4x1xf32> to vector<1x4x256xf32>
    %20 = arith.mulf %17, %19 : vector<1x4x256xf32>
    %c0_17 = arith.constant 0 : index
    %c0_18 = arith.constant 0 : index
    %c0_19 = arith.constant 0 : index
    %21 = vector.load %arg6[%c0_17, %c0_18, %c0_19] : memref<1x4x256xf32, #tpu.memory_space<vmem>>, vector<1x4x256xf32>
    tpu.vector_store %arg6[%c0_17, %c0_18, %c0_19], %20 {strides = array<i32>} : memref<1x4x256xf32, #tpu.memory_space<vmem>>, vector<1x4x256xf32>,
    return
  }
  func.func @transform_0(%arg0: i32) -> (i32, i32, i32) {
    %c0_i32 = arith.constant 0 : i32
    %c0_i32_0 = arith.constant 0 : i32
    %c0_i32_1 = arith.constant 0 : i32
    return %arg0, %c0_i32, %c0_i32_0 : i32, i32, i32
  }
  func.func @transform_1(%arg0: i32) -> (i32, i32) {
    %c0_i32 = arith.constant 0 : i32
    %c0_i32_0 = arith.constant 0 : i32
    %c0_i32_1 = arith.constant 0 : i32
    return %c0_i32, %c0_i32_0 : i32, i32
  }
  func.func @transform_2(%arg0: i32) -> (i32, i32) {
    %c0_i32 = arith.constant 0 : i32
    %c0_i32_0 = arith.constant 0 : i32
    %c0_i32_1 = arith.constant 0 : i32
    return %c0_i32, %c0_i32_0 : i32, i32
  }
  func.func @transform_3(%arg0: i32) -> (i32, i32) {
    %c0_i32 = arith.constant 0 : i32
    %c0_i32_0 = arith.constant 0 : i32
    %c0_i32_1 = arith.constant 0 : i32
    return %c0_i32, %c0_i32_0 : i32, i32
  }
  func.func @transform_4(%arg0: i32) -> (i32, i32) {
    %c0_i32 = arith.constant 0 : i32
    %c0_i32_0 = arith.constant 0 : i32
    %c0_i32_1 = arith.constant 0 : i32
    return %c0_i32, %c0_i32_0 : i32, i32
  }
  func.func @transform_5(%arg0: i32) -> (i32, i32, i32) {
    %c0_i32 = arith.constant 0 : i32
    %c0_i32_0 = arith.constant 0 : i32
    %c0_i32_1 = arith.constant 0 : i32
    return %arg0, %c0_i32, %c0_i32_0 : i32, i32, i32
  }
}

</mosaic_0001>

<bundles_post_ra>
// kernel: tpu_custom_call.1
= control target key start
LH: loop header
LB: loop body
LE: loop exit
PB: predicated region body
PF: predicated region fallthrough
CT: control target
= control target key end

     0   :  { %10 = vsyncpa [#allocation3], 0  ;;  %s901_s0 = inlined_call_operand.hbm [shape: f32[2,4,256], index: 0, kind: input, shape index: {}]   ;;  %s902_s1 = inlined_call_operand.vmem [shape: f32[4,2], index: 1, kind: input, shape index: {}]   ;;  %s903_s2 = inlined_call_operand.vmem [shape: f32[1,2], index: 2, kind: input, shape index: {}]   ;;  %s904_s3 = inlined_call_operand.vmem [shape: f32[2,4], index: 3, kind: input, shape index: {}]   ;;  %s905_s4 = inlined_call_operand.vmem [shape: f32[1,4], index: 4, kind: input, shape index: {}]   ;;  %s906_s5 = inlined_call_operand.hbm [shape: f32[2,4,256], index: 5, kind: output, shape index: {}]  }
   0x1   :  { %12 = vsyncpa [#allocation3 + $0x1], 0 }
   0x2   :  { %13 = vsyncpa [#allocation4], 0 }
   0x3   :  { %15 = vsyncpa [#allocation4 + $0x1], 0  ;;  %s744_s18 = smov 0   ;;  %s746_s19 = smov 0  }
   0x4   :  { %s748_s20 = smov 0   ;;  %s750_s21 = smov 0  }
   0x5 LB: > { %s765_s22 = sadd.s32 4294967295, %s707_s21   ;;  %s526_s23 = sadd.s32 4294967294, %s707_s21   ;;  %s707_s21 = sphi %s750_s21, %s923_s21   ;;  %s703_s20 = sphi %s748_s20, %s922_s20   ;;  %s699_s19 = sphi %s746_s19, %s921_s19   ;;  %s695_s18 = sphi %s744_s18, %s920_s18  }
   0x6   : > { %s769_s24 = sadd.s32 1, %s707_s21   ;;  %s28_s25 = sadd.s32 1, %s703_s20 }
   0x7   : > { %s25_s26 = ssub.s32 %s707_s21, %s769_s24  ;;  %p35_p0 = scmp.ne.s32.totalorder %s703_s20, %s699_s19 }
   0x8   : > { %p26_p1 = scmp.eq.s32.totalorder %s25_s26, 0  ;;  %p36_p2 = scmp.eq.s32.totalorder %s707_s21, 0 }
   0x9   : > { %p41_p3 = scmp.ne.s32.totalorder %s699_s19, %s695_s18  ;;  %p42_p4 = scmp.eq.s32.totalorder %s765_s22, 0 }
   0xa   : > { %s781_s27 = scalar_select %p26_p1, %s703_s20, %s28_s25  }
   0xb   : > { %p783_p5 = por %p36_p2, %p35_p0  ;;  %p787_p6 = por %p42_p4, %p41_p3 }
   0xc   : > { %p149_p7 = scmp.eq.s32.totalorder %s765_s22, 1  ;;  %p155_p8 = scmp.eq.s32.totalorder %s526_s23, 1 }
   0xd   : > { %s910_s29 = scalar_select %p787_p6, 1, 0 }
   0xe   : > { %p573_p10 = scmp.lt.s32.totalorder %s707_s21, 2  ;;  %p794_p11 = por %p149_p7, %p35_p0 }
   0xf   : > { %p798_p12 = por %p155_p8, %p41_p3  ;;  %s187_s7 = sand.u32 1, %s703_s20  }
  0x10   : > { %s911_s30 = scalar_select %p794_p11, 1, 0 }
  0x11   : > { %s912_s6 = scalar_select %p798_p12, 1, 0 }
  0x12   : > { %s545_s8 = sshll.u32 %s707_s21, 7  ;;  %s529_s9 = sshll.u32 %s187_s7, 3 }
  0x13   : > { %s807_s12 = scalar_lea.hbm %s901_s0, %s545_s8  ;;  %s191_s13 = scalar_lea.vmem [#allocation2], %s529_s9 }
  0x14   : > { %s199_s14 = sshll.u32 %s191_s13, 4  ;;  %p811_p13 = pnand %p573_p10, %p783_p5  ;;  %s815_s14 = int_to_ptr.vmem [resolvable:$true] %s199_s14 }
  0x15   : > { %s188_s16 = scalar_lea.sflag [#allocation3], %s187_s7  ;;  %s615_s17 = scalar_lea.hbm %s807_s12, 128 }
  0x16   : > { %p616_p2 = scmp.ne.s32.totalorder %s807_s12, %s615_s17  ;;  %p617_p3 = pneg %p811_p13 }
  0x17   : > { %s620_s26 = scalar_lea.hbm %s901_s0, 256  ;;  %p621_p5 = scmp.lt.s32.totalorder %s807_s12, %s901_s0 }
  0x18   : > { %p618_p4 = pnand %p617_p3, %p616_p2  ;;  %p622_p8 = scmp.lt.s32.totalorder %s620_s26, %s615_s17 }
  0x1a   : > { %p619_p7 = pneg %p618_p4  ;;  %p623_p10 = por %p622_p8, %p621_p5 }
  0x1c   : > { %p624_p9 = pnand %p623_p10, %p619_p7 }
  0x1e   : > { %627 = shalt.err (!%p624_p9)
}
  0x1f   : > { %s628_s7 = scalar_lea.vmem %s815_s14, 128  ;;  %s709_s9 = smov [#allocation2]  }
  0x20   : > { %p629_p0 = scmp.ne.s32.totalorder %s815_s14, %s628_s7  ;;  %s633_s10 = sshll.u32 %s709_s9, 4  ;;  %s634_s10 = int_to_ptr.vmem [resolvable:$false] %s633_s10 }
  0x21   : > { %s635_s11 = scalar_lea.vmem %s634_s10, 256  ;;  %p636_p4 = scmp.lt.s32.totalorder %s815_s14, %s634_s10 }
  0x22   : > { %p631_p1 = pnand %p629_p0, %p617_p3  ;;  %p637_p12 = scmp.lt.s32.totalorder %s635_s11, %s628_s7 }
  0x24   : > { %p632_p2 = pneg %p631_p1  ;;  %p638_p11 = por %p637_p12, %p636_p4 }
  0x26   : > { %p639_p6 = pnand %p638_p11, %p632_p2 }
  0x28   : > { %642 = shalt.err (!%p639_p6)
}
  0x29   : > { %568 = dma.hbm_to_vmem [thread:$0]  (!%p811_p13), %s807_s12, 128, %s815_s14, %s188_s16  }
  0x2a   : > { %p914_p9 = scmp.lt.s32.totalorder %s707_s21, 3  ;;  %p915_p7 = scmp.ge.s32.totalorder %s707_s21, 1 }
  0x2c   : > { %p205_p0 = pnand %p915_p7, %p914_p9 }
  0x2d   : > { %s842_s13 = sand.u32 (!%p205_p0), 1, %s699_s19   ;;  %p916_p6 = scmp.ne.s32.totalorder (!%p205_p0), %s910_s29, 0 }
  0x2e   : > { %208 = sbr.rel (%p205_p0) target bundleno = 756 (0x2f4), region = 40  ;;  %s533_s17 = sshll.u32 (!%p205_p0), %s842_s13, 3 }
  0x2f   : > { %s211_s23 = scalar_lea.sflag (!%p205_p0), [#allocation3], %s842_s13  ;;  %s214_s15 = scalar_lea.vmem (!%p205_p0), [#allocation2], %s533_s17 }
  0x33   : > { %686 = dma.done.wait (%p916_p6), %s211_s23, 128  }
  0x34   : > { %688 = vsyncadd (%p916_p6), %s211_s23, 4294967168  ;;  %vm245_vm0 = vcmask 1043456   ;;  %v241_v0 = vld [vmem:[%s214_s15] sm:$0xff]  ;;  %v710_v5 = vmov 0.0   ;;  %vm711_vm1 = vmmov 0   ;;  %v254_v7 = vlaneseq  ;;  %s546_s7 = sshll.u32 %s765_s22, 7 }
  0x35   : > { %v243_v1 = vcombine.high %v241_v0, %v241_v0  ;;  %v246_v2 = vsel %vm245_vm0, %v241_v0, 0.0  ;;  %551 = vmatprep.subr.mxu0 %v710_v5  ;;  %v251_v6 = vld [vmem:[%s902_s1] sm:$0xf]  ;;  %556 = vmatprep.subr.mxu1 %v710_v5  ;;  %vm260_vm2 = vcmask 31744   ;;  %vm343_vm3 = vcmask 1041408   ;;  %s240_s9 = scalar_lea.vmem [#allocation5], %s533_s17  ;;  %s454_s15 = scalar_lea.hbm %s906_s5, %s546_s7 }
  0x36   : > { %552 = vmatpush3.msk.msra.mxu0 %vm245_vm0, %v251_v6  ;;  %553 = vmatprep.mubr.msk.f32.mxu0 %vm711_vm1, %v710_v5  ;;  %v255_v8 = vand.u32 127, %v254_v7  ;;  %v257_v9 = vshrl.u32 %v254_v7, 7  ;;  %v337_v13 = vld [vmem:[%s904_s3] sm:$0x3]  ;;  %vm339_vm4 = vcmask 15360   ;;  %s456_s10 = sshll.u32 %s240_s9, 4  ;;  %s457_s10 = int_to_ptr.vmem [resolvable:$true] %s456_s10 }
  0x37   : > { %v247_v3 = vsel %vm245_vm0, %v243_v1, 0.0  ;;  %558 = vmatprep.mubr.msk.f32.mxu1 %vm711_vm1, %v710_v5  ;;  %557 = vmatpush3.msk.msra.mxu1 %vm343_vm3, %v337_v13  ;;  %v252_v14 = vld [vmem:[%s903_s2] sm:$0x1]  ;;  %v712_v29 = vmov 839922192   ;;  %s442_s12 = scalar_lea.sflag [#allocation4], %s842_s13 }
  0x38   : > { %v248_v4 = vadd.f32 %v247_v3, %v246_v2  ;;  %v258_v10 = vsub.s32 %v255_v8, %v257_v9  ;;  %v338_v19 = vld [vmem:[%s905_s4] sm:$0x1]  ;;  %v425_v26 = vsub.s32 0, %v257_v9  ;;  %v432_v30 = vunpack.c.l.s4 %v712_v29  ;;  %s643_s14 = scalar_lea.vmem %s457_s10, 128  ;;  %p917_p12 = scmp.ne.s32.totalorder %s911_s30, 0 }
  0x39   : > { %p644_p11 = scmp.ne.s32.totalorder %s457_s10, %s643_s14  ;;  %s713_s29 = smov [#allocation5]  }
  0x3a   : > { %249 = vadd.xlane.f32.xlu0 %v248_v4  ;;  %v433_v31 = vunpack.c.0.s8 %v432_v30  ;;  %s647_s16 = sshll.u32 %s713_s29, 4  ;;  %s648_s16 = int_to_ptr.vmem [resolvable:$false] %s647_s16 }
  0x3b   : > { %p645_p13 = pnand %p644_p11, %p917_p12  ;;  %s649_s22 = scalar_lea.vmem %s648_s16, 256 }
  0x3c   : > { %v436_v32 = vsub.s32 %v433_v31, %v257_v9  ;;  %p650_p3 = scmp.lt.s32.totalorder %s457_s10, %s648_s16  ;;  %p651_p5 = scmp.lt.s32.totalorder %s649_s22, %s643_s14 }
  0x3d   : > { %p646_p1 = pneg %p645_p13 }
  0x3e   : > { %p652_p8 = por %p651_p5, %p650_p3 }
  0x40   : > { %p653_p10 = pnand %p652_p8, %p646_p1 }
  0xc3   : > { %v250_v11 = vpop.xlane.xlu0 %249 }
  0xc4   : > { %v259_v12 = vrot.slane %v250_v11, %v258_v10 }
  0xc6   : > { %554 = vmatmul.mubr.msk.f32.vlgmr.msra.gmra.mxu0 %vm260_vm2, %v259_v12 }
 0x186   : > { %v332_v15 = vpop.f32.mrf.mxu0 }
 0x187   : > { %v333_v16 = vadd.f32 %v332_v15, %v252_v14 }
 0x188   : > { %v555_v17 = vpop.f32.mrf.mxu0 }
 0x189   : > { %v336_v18 = vmax.f32 %v333_v16, 0.0 }
 0x18b   : > { %559 = vmatmul.mubr.msk.f32.vlgmr.msra.gmra.mxu1 %vm339_vm4, %v336_v18 }
 0x24b   : > { %v413_v20 = vpop.f32.mrf.mxu1 }
 0x24c   : > { %v414_v21 = vadd.f32 %v413_v20, %v338_v19 }
 0x24d   : > { %v560_v22 = vpop.f32.mrf.mxu1 }
 0x24e   : > { %v539_v23 = vmul.f32 -1.442695, %v414_v21 }
 0x250   : > { %611 = vpow2.f32 %v539_v23 }
 0x25d   : > { %v612_v24 = vpop.eup %611 }
 0x25e   : > { %v420_v25 = vadd.f32 1.0, %v612_v24 }
 0x260   : > { %613 = vrcp.f32 %v420_v25 }
 0x26d   : > { %v614_v27 = vpop.eup %613 }
 0x26e   : > { %v426_v28 = vrot.slane %v614_v27, %v425_v26 }
 0x270   : > { %428 = vbcast.lane.b32.xlu0 %v426_v28, 256 }
 0x2e2   : > { %v429_v33 = vpop.permute.xlu0 %428 }
 0x2e3   : > { %v437_v34 = vrot.slane %v429_v33, %v436_v32 }
 0x2e5   : > { %v439_v35 = vmul.f32 %v437_v34, %v241_v0 }
 0x2e7   : > { %440 = vst [vmem:[%s240_s9] sm:$0xff] %v439_v35 }
 0x2e8   : > { %656 = shalt.err (!%p653_p10)
}
 0x2e9   : > { %s657_s17 = scalar_lea.hbm %s454_s15, 128  ;;  %s661_s26 = scalar_lea.hbm %s906_s5, 256 }
 0x2ea   : > { %p658_p2 = scmp.ne.s32.totalorder %s454_s15, %s657_s17  ;;  %p662_p7 = scmp.lt.s32.totalorder %s454_s15, %s906_s5 }
 0x2eb   : > { %p663_p0 = scmp.lt.s32.totalorder %s661_s26, %s657_s17 }
 0x2ec   : > { %p659_p4 = pnand %p658_p2, %p917_p12 }
 0x2ed   : > { %p664_p6 = por %p663_p0, %p662_p7 }
 0x2ee   : > { %p660_p9 = pneg %p659_p4 }
 0x2f0   : > { %p665_p11 = pnand %p664_p6, %p660_p9 }
 0x2f2   : > { %668 = shalt.err (!%p665_p11)
}
 0x2f3   : > { %563 = dma.vmem_to_hbm [thread:$0]  (%p917_p12), %s457_s10, 128, %s454_s15, %s442_s12  }
 0x2f4 PF: > { %s468_s7 = sand.u32 1, %s695_s18   ;;  %p918_p13 = scmp.ne.s32.totalorder %s912_s6, 0 }
 0x2f5   : > { %p919_p1 = scmp.ge.s32.totalorder %s707_s21, 2  ;;  %s469_s9 = scalar_lea.sflag [#allocation4], %s468_s7 }
 0x2f7   : > { %p570_p3 = pnand %p919_p1, %p918_p13 }
 0x2f9   : > { %p571_p5 = pneg %p570_p3 }
 0x2fb   : > { %690 = dma.done.wait (%p571_p5), %s469_s9, 128  }
 0x2fc   : > { %692 = vsyncadd (%p571_p5), %s469_s9, 4294967168  ;;  %p18_p8 = scmp.ge.s32.totalorder %s769_s24, 4   ;;  %s920_s18 = smov %s699_s19 }
 0x2fd   : > { %s921_s19 = smov %s703_s20  ;;  %s922_s20 = smov %s781_s27 }
 0x2fe   : > { %s923_s21 = smov %s769_s24  ;;  %20 = sbr.rel (!%p18_p8) target bundleno = 5 (0x5), region = 85 }
 0x303   :  { %474 = vsyncpa [#allocation3], 1 }
 0x304   :  { %476 = vsyncpa [#allocation3 + $0x1], 1 }
 0x305   :  { %477 = vsyncpa [#allocation4], 1 }
 0x306   :  { %479 = vsyncpa [#allocation4 + $0x1], 1 }

</bundles_post_ra>
